<compile_context>
chip_gen: v7x
topology: tpu7x:2x2x1
jax: 0.10.0
libtpu: 0.0.40
codegen_flags: <defaults>
</compile_context>

<pallas_src>
import jax
import jax.numpy as jnp
from jax.experimental import pallas as pl
from jax.experimental.pallas import tpu as pltpu

LOOKBACK = 8
IN_DIM = LOOKBACK * 4                         # 32
LAYER_DIMS = [IN_DIM, 128, 256, 256, 128, 64, 4]
OUT_DIM = LAYER_DIMS[-1]                      # 4

# Lane-padded layer output widths used inside the kernel (exact zero-padding).
PADDED_OUT = (128, 256, 256, 128, 128, 128)

TB_MAX = 2048                                 # batch-tile cap (few MiB of VMEM at most)


def _cdiv(a, b):
    return -(-a // b)


def _round_up(n, m):
    return _cdiv(n, m) * m


def _choose_tiling(batch):
    """Return (tile_rows, padded_rows).

    Tiles are 8-row aligned, <= TB_MAX, and whenever the batch allows it there
    are at least 2 (preferably an even number of) grid steps so v7x's two
    TensorCores both get work. Ragged batches pad by at most ~8 rows/tile.
    """
    pb8 = _round_up(batch, 8)
    if pb8 <= 8:
        return pb8, pb8
    num_tiles = max(2, _cdiv(pb8, TB_MAX))
    if num_tiles % 2:                         # prefer an even number of grid steps
        num_tiles += 1
    tb = min(TB_MAX, _round_up(_cdiv(pb8, num_tiles), 8))
    num_tiles = _cdiv(pb8, tb)
    return tb, tb * num_tiles


# ---------------------------------------------------------------------------
# Kernel
# ---------------------------------------------------------------------------
def mlp_kernel(x_ref,
               w1_ref, w2_ref, w3_ref, w4_ref, w5_ref, w6_ref,
               b_ref, o_ref):
    """Fused 6-layer MLP for one (TB, IN_DIM) batch tile.

    Weights are bf16 (MXU native), matmuls accumulate in f32 via
    preferred_element_type; bias add / ReLU run in f32 on the VPU.
    """
    bias = b_ref[...]                                    # (8, 256) f32, stacked biases
    h = x_ref[...].astype(jnp.bfloat16)                  # no-op if caller passes bf16

    def layer(h_bf16, w_ref, row, width, relu):
        y = jnp.dot(h_bf16, w_ref[...], preferred_element_type=jnp.float32)
        y = y + bias[row:row + 1, :width]
        if relu:
            y = jnp.maximum(y, 0.0)
        return y

    h = layer(h, w1_ref, 0, PADDED_OUT[0], True).astype(jnp.bfloat16)
    h = layer(h, w2_ref, 1, PADDED_OUT[1], True).astype(jnp.bfloat16)
    h = layer(h, w3_ref, 2, PADDED_OUT[2], True).astype(jnp.bfloat16)
    h = layer(h, w4_ref, 3, PADDED_OUT[3], True).astype(jnp.bfloat16)
    h = layer(h, w5_ref, 4, PADDED_OUT[4], True).astype(jnp.bfloat16)  # cols 64:128 stay 0
    y = layer(h, w6_ref, 5, PADDED_OUT[5], False)                       # cols 4:128 stay 0
    # Narrow masked store: only the 4 real output lanes go back to HBM.
    o_ref[...] = y[:, :OUT_DIM].astype(o_ref.dtype)


# ---------------------------------------------------------------------------
# Parameter construction / packing
# ---------------------------------------------------------------------------
def make_params(key):
    """PyTorch-style uniform init; weights stored as (in, out) = W_pt.T."""
    params = []
    for i in range(len(LAYER_DIMS) - 1):
        fan_in, fan_out = LAYER_DIMS[i], LAYER_DIMS[i + 1]
        key, kw, kb = jax.random.split(key, 3)
        bound = 1.0 / jnp.sqrt(jnp.float32(fan_in))
        w = jax.random.uniform(kw, (fan_in, fan_out), jnp.float32, -bound, bound)
        b = jax.random.uniform(kb, (fan_out,), jnp.float32, -bound, bound)
        params.append((w, b))
    return params


def pack_params(params):
    """Cast weights to bf16, zero-pad the narrow tail layers, stack biases."""
    (w1, b1), (w2, b2), (w3, b3), (w4, b4), (w5, b5), (w6, b6) = params

    w5p = jnp.pad(w5, ((0, 0), (0, 128 - 64)))            # (128, 64) -> (128, 128)
    w6p = jnp.pad(w6, ((0, 128 - 64), (0, 128 - 4)))       # (64, 4)   -> (128, 128)

    weights = tuple(w.astype(jnp.bfloat16) for w in (w1, w2, w3, w4, w5p, w6p))

    bias = jnp.zeros((8, 256), jnp.float32)
    for i, bvec in enumerate((b1, b2, b3, b4, b5, b6)):
        bias = bias.at[i, :bvec.shape[-1]].set(bvec)
    return weights, bias


# ---------------------------------------------------------------------------
# Forward pass
# ---------------------------------------------------------------------------
@jax.jit
def simple_model_forward(x, weights, bias):
    batch = x.shape[0]
    tb, padded = _choose_tiling(batch)
    if padded != batch:
        x = jnp.pad(x, ((0, padded - batch), (0, 0)))

    grid = (padded // tb,)

    x_spec = pl.BlockSpec((tb, IN_DIM), lambda i: (i, 0))
    # Constant index maps -> DMA'd once and VMEM-resident; single-buffered since
    # the block never changes across grid steps.
    w_specs = [pl.BlockSpec(w.shape, lambda i: (0, 0), pipeline_mode=pl.Buffered(1))
               for w in weights]
    b_spec = pl.BlockSpec(bias.shape, lambda i: (0, 0), pipeline_mode=pl.Buffered(1))
    # Narrow output block: last block dim equals the full array dim, so it is legal.
    out_spec = pl.BlockSpec((tb, OUT_DIM), lambda i: (i, 0))

    # Roofline hints for XLA's scheduler.
    mac_per_row = sum(a * b for a, b in
                      zip([IN_DIM, 128, 256, 256, 128, 128], PADDED_OUT))
    flops = 2 * padded * mac_per_row
    weight_bytes = sum(w.size * w.dtype.itemsize for w in weights)
    bytes_accessed = (padded * IN_DIM * x.dtype.itemsize) + weight_bytes \
                     + bias.size * 4 + padded * OUT_DIM * 4

    out_padded = pl.pallas_call(
        mlp_kernel,
        out_shape=jax.ShapeDtypeStruct((padded, OUT_DIM), jnp.float32),
        grid=grid,
        in_specs=[x_spec] + w_specs + [b_spec],
        out_specs=out_spec,
        compiler_params=pltpu.CompilerParams(
            dimension_semantics=("parallel",),
            vmem_limit_bytes=48 * 1024 * 1024),
        cost_estimate=pl.CostEstimate(
            flops=flops, transcendentals=0, bytes_accessed=bytes_accessed),
    )(x, *weights, bias)

    return out_padded if padded == batch else out_padded[:batch]


# ---------------------------------------------------------------------------
# References
# ---------------------------------------------------------------------------
def reference_forward_f32(x, params):
    h = x
    for i, (w, b) in enumerate(params):
        h = h @ w + b
        if i < len(params) - 1:
            h = jnp.maximum(h, 0.0)
    return h


def reference_forward_bf16(x, params):
    """Mimics the kernel's numerics: bf16 operands, f32 accumulation."""
    h = x
    for i, (w, b) in enumerate(params):
        y = jnp.dot(h.astype(jnp.bfloat16), w.astype(jnp.bfloat16),
                    preferred_element_type=jnp.float32) + b
        h = jnp.maximum(y, 0.0) if i < len(params) - 1 else y
    return h


# ---------------------------------------------------------------------------
if __name__ == "__main__":
    key = jax.random.PRNGKey(0)
    key, kx = jax.random.split(key)

    params = make_params(key)
    weights, bias = pack_params(params)

    # Small single-tile case (grid=(1,), batch rows already 8-aligned).
    batch = 8
    x = jax.random.normal(kx, (batch, IN_DIM), dtype=jnp.float32)
    out = jax.block_until_ready(simple_model_forward(x, weights, bias))
    assert out.shape == (batch, OUT_DIM), out.shape
    assert jnp.allclose(out, reference_forward_bf16(x, params), atol=2e-2, rtol=2e-2), \
        "mismatch vs bf16 reference (batch=8)"
    assert jnp.allclose(out, reference_forward_f32(x, params), atol=6e-2, rtol=6e-2), \
        "mismatch vs f32 reference (batch=8)"

    # Ragged multi-tile case: 20 rows -> 2 tiles of 16 rows (grid=(2,)), pads 20 -> 32.
    key, kx2 = jax.random.split(key)
    batch2 = 20
    x2 = jax.random.normal(kx2, (batch2, IN_DIM), dtype=jnp.float32)
    out2 = jax.block_until_ready(simple_model_forward(x2, weights, bias))
    assert out2.shape == (batch2, OUT_DIM), out2.shape
    assert jnp.allclose(out2, reference_forward_bf16(x2, params), atol=2e-2, rtol=2e-2), \
        "mismatch vs bf16 reference (batch=20)"

    print("KERNEL_OK")
</pallas_src>

<mosaic_0001>
module attributes {stable_mosaic.version = 11 : i64} {
  func.func @mlp_kernel(%arg0: i32, %arg1: memref<8x32xf32, #tpu.memory_space<vmem>>, %arg2: memref<32x128xbf16, #tpu.memory_space<vmem>>, %arg3: memref<128x256xbf16, #tpu.memory_space<vmem>>, %arg4: memref<256x256xbf16, #tpu.memory_space<vmem>>, %arg5: memref<256x128xbf16, #tpu.memory_space<vmem>>, %arg6: memref<128x128xbf16, #tpu.memory_space<vmem>>, %arg7: memref<128x128xbf16, #tpu.memory_space<vmem>>, %arg8: memref<8x256xf32, #tpu.memory_space<vmem>>, %arg9: memref<8x4xf32, #tpu.memory_space<vmem>>) attributes {dimension_semantics = [#tpu.dimension_semantics<parallel>], iteration_bounds = array<i64: 1>, scalar_prefetch = 0 : i64, scratch_operands = 0 : i64, tpu.core_type = #tpu.core_type<tc>, window_params = [{transform_indices = @transform_0, window_bounds = array<i64: 8, 32>}, {pipeline_mode = #tpu.pipeline_mode<synchronous>, transform_indices = @transform_1, window_bounds = array<i64: 32, 128>}, {pipeline_mode = #tpu.pipeline_mode<synchronous>, transform_indices = @transform_2, window_bounds = array<i64: 128, 256>}, {pipeline_mode = #tpu.pipeline_mode<synchronous>, transform_indices = @transform_3, window_bounds = array<i64: 256, 256>}, {pipeline_mode = #tpu.pipeline_mode<synchronous>, transform_indices = @transform_4, window_bounds = array<i64: 256, 128>}, {pipeline_mode = #tpu.pipeline_mode<synchronous>, transform_indices = @transform_5, window_bounds = array<i64: 128, 128>}, {pipeline_mode = #tpu.pipeline_mode<synchronous>, transform_indices = @transform_6, window_bounds = array<i64: 128, 128>}, {pipeline_mode = #tpu.pipeline_mode<synchronous>, transform_indices = @transform_7, window_bounds = array<i64: 8, 256>}, {transform_indices = @transform_8, window_bounds = array<i64: 8, 4>}]} {
    %c0 = arith.constant 0 : index
    %c0_0 = arith.constant 0 : index
    %0 = vector.load %arg8[%c0, %c0_0] : memref<8x256xf32, #tpu.memory_space<vmem>>, vector<8x256xf32>
    %c0_1 = arith.constant 0 : index
    %c0_2 = arith.constant 0 : index
    %1 = vector.load %arg1[%c0_1, %c0_2] : memref<8x32xf32, #tpu.memory_space<vmem>>, vector<8x32xf32>
    %2 = arith.truncf %1 : vector<8x32xf32> to vector<8x32xbf16>
    %c0_3 = arith.constant 0 : index
    %c0_4 = arith.constant 0 : index
    %3 = vector.load %arg2[%c0_3, %c0_4] : memref<32x128xbf16, #tpu.memory_space<vmem>>, vector<32x128xbf16>
    %cst = arith.constant dense<0.000000e+00> : vector<8x128xf32>
    %4 = tpu.matmul %2, %3, %cst {dimension_numbers = #tpu.dot_dimension_numbers<[1], [0], [0], [1], [0, 0, 1, 1], [], []>} : vector<8x32xbf16>, vector<32x128xbf16>, vector<8x128xf32> -> vector<8x128xf32>
    %5 = vector.extract_strided_slice %0 {offsets = [0, 0], sizes = [1, 128], strides = [1, 1]} : vector<8x256xf32> to vector<1x128xf32>
    %6 = vector.broadcast %5 : vector<1x128xf32> to vector<8x128xf32>
    %7 = arith.addf %4, %6 : vector<8x128xf32>
    %cst_5 = arith.constant 0.000000e+00 : f32
    %8 = vector.broadcast %cst_5 : f32 to vector<8x128xf32>
    %9 = arith.maximumf %7, %8 : vector<8x128xf32>
    %10 = arith.truncf %9 : vector<8x128xf32> to vector<8x128xbf16>
    %c0_6 = arith.constant 0 : index
    %c0_7 = arith.constant 0 : index
    %11 = vector.load %arg3[%c0_6, %c0_7] : memref<128x256xbf16, #tpu.memory_space<vmem>>, vector<128x256xbf16>
    %cst_8 = arith.constant dense<0.000000e+00> : vector<8x256xf32>
    %12 = tpu.matmul %10, %11, %cst_8 {dimension_numbers = #tpu.dot_dimension_numbers<[1], [0], [0], [1], [0, 0, 1, 1], [], []>} : vector<8x128xbf16>, vector<128x256xbf16>, vector<8x256xf32> -> vector<8x256xf32>
    %13 = vector.extract_strided_slice %0 {offsets = [1, 0], sizes = [1, 256], strides = [1, 1]} : vector<8x256xf32> to vector<1x256xf32>
    %14 = vector.broadcast %13 : vector<1x256xf32> to vector<8x256xf32>
    %15 = arith.addf %12, %14 : vector<8x256xf32>
    %cst_9 = arith.constant 0.000000e+00 : f32
    %16 = vector.broadcast %cst_9 : f32 to vector<8x256xf32>
    %17 = arith.maximumf %15, %16 : vector<8x256xf32>
    %18 = arith.truncf %17 : vector<8x256xf32> to vector<8x256xbf16>
    %c0_10 = arith.constant 0 : index
    %c0_11 = arith.constant 0 : index
    %19 = vector.load %arg4[%c0_10, %c0_11] : memref<256x256xbf16, #tpu.memory_space<vmem>>, vector<256x256xbf16>
    %cst_12 = arith.constant dense<0.000000e+00> : vector<8x256xf32>
    %20 = tpu.matmul %18, %19, %cst_12 {dimension_numbers = #tpu.dot_dimension_numbers<[1], [0], [0], [1], [0, 0, 1, 1], [], []>} : vector<8x256xbf16>, vector<256x256xbf16>, vector<8x256xf32> -> vector<8x256xf32>
    %21 = vector.extract_strided_slice %0 {offsets = [2, 0], sizes = [1, 256], strides = [1, 1]} : vector<8x256xf32> to vector<1x256xf32>
    %22 = vector.broadcast %21 : vector<1x256xf32> to vector<8x256xf32>
    %23 = arith.addf %20, %22 : vector<8x256xf32>
    %cst_13 = arith.constant 0.000000e+00 : f32
    %24 = vector.broadcast %cst_13 : f32 to vector<8x256xf32>
    %25 = arith.maximumf %23, %24 : vector<8x256xf32>
    %26 = arith.truncf %25 : vector<8x256xf32> to vector<8x256xbf16>
    %c0_14 = arith.constant 0 : index
    %c0_15 = arith.constant 0 : index
    %27 = vector.load %arg5[%c0_14, %c0_15] : memref<256x128xbf16, #tpu.memory_space<vmem>>, vector<256x128xbf16>
    %cst_16 = arith.constant dense<0.000000e+00> : vector<8x128xf32>
    %28 = tpu.matmul %26, %27, %cst_16 {dimension_numbers = #tpu.dot_dimension_numbers<[1], [0], [0], [1], [0, 0, 1, 1], [], []>} : vector<8x256xbf16>, vector<256x128xbf16>, vector<8x128xf32> -> vector<8x128xf32>
    %29 = vector.extract_strided_slice %0 {offsets = [3, 0], sizes = [1, 128], strides = [1, 1]} : vector<8x256xf32> to vector<1x128xf32>
    %30 = vector.broadcast %29 : vector<1x128xf32> to vector<8x128xf32>
    %31 = arith.addf %28, %30 : vector<8x128xf32>
    %cst_17 = arith.constant 0.000000e+00 : f32
    %32 = vector.broadcast %cst_17 : f32 to vector<8x128xf32>
    %33 = arith.maximumf %31, %32 : vector<8x128xf32>
    %34 = arith.truncf %33 : vector<8x128xf32> to vector<8x128xbf16>
    %c0_18 = arith.constant 0 : index
    %c0_19 = arith.constant 0 : index
    %35 = vector.load %arg6[%c0_18, %c0_19] : memref<128x128xbf16, #tpu.memory_space<vmem>>, vector<128x128xbf16>
    %cst_20 = arith.constant dense<0.000000e+00> : vector<8x128xf32>
    %36 = tpu.matmul %34, %35, %cst_20 {dimension_numbers = #tpu.dot_dimension_numbers<[1], [0], [0], [1], [0, 0, 1, 1], [], []>} : vector<8x128xbf16>, vector<128x128xbf16>, vector<8x128xf32> -> vector<8x128xf32>
    %37 = vector.extract_strided_slice %0 {offsets = [4, 0], sizes = [1, 128], strides = [1, 1]} : vector<8x256xf32> to vector<1x128xf32>
    %38 = vector.broadcast %37 : vector<1x128xf32> to vector<8x128xf32>
    %39 = arith.addf %36, %38 : vector<8x128xf32>
    %cst_21 = arith.constant 0.000000e+00 : f32
    %40 = vector.broadcast %cst_21 : f32 to vector<8x128xf32>
    %41 = arith.maximumf %39, %40 : vector<8x128xf32>
    %42 = arith.truncf %41 : vector<8x128xf32> to vector<8x128xbf16>
    %c0_22 = arith.constant 0 : index
    %c0_23 = arith.constant 0 : index
    %43 = vector.load %arg7[%c0_22, %c0_23] : memref<128x128xbf16, #tpu.memory_space<vmem>>, vector<128x128xbf16>
    %cst_24 = arith.constant dense<0.000000e+00> : vector<8x128xf32>
    %44 = tpu.matmul %42, %43, %cst_24 {dimension_numbers = #tpu.dot_dimension_numbers<[1], [0], [0], [1], [0, 0, 1, 1], [], []>} : vector<8x128xbf16>, vector<128x128xbf16>, vector<8x128xf32> -> vector<8x128xf32>
    %45 = vector.extract_strided_slice %0 {offsets = [5, 0], sizes = [1, 128], strides = [1, 1]} : vector<8x256xf32> to vector<1x128xf32>
    %46 = vector.broadcast %45 : vector<1x128xf32> to vector<8x128xf32>
    %47 = arith.addf %44, %46 : vector<8x128xf32>
    %48 = vector.extract_strided_slice %47 {offsets = [0, 0], sizes = [8, 4], strides = [1, 1]} : vector<8x128xf32> to vector<8x4xf32>
    %c0_25 = arith.constant 0 : index
    %c0_26 = arith.constant 0 : index
    %49 = vector.load %arg9[%c0_25, %c0_26] : memref<8x4xf32, #tpu.memory_space<vmem>>, vector<8x4xf32>
    tpu.vector_store %arg9[%c0_25, %c0_26], %48 {strides = array<i32>} : memref<8x4xf32, #tpu.memory_space<vmem>>, vector<8x4xf32>,
    return
  }
  func.func @transform_0(%arg0: i32) -> (i32, i32) {
    %c0_i32 = arith.constant 0 : i32
    %c0_i32_0 = arith.constant 0 : i32
    return %arg0, %c0_i32 : i32, i32
  }
  func.func @transform_1(%arg0: i32) -> (i32, i32) {
    %c0_i32 = arith.constant 0 : i32
    %c0_i32_0 = arith.constant 0 : i32
    %c0_i32_1 = arith.constant 0 : i32
    return %c0_i32, %c0_i32_0 : i32, i32
  }
  func.func @transform_2(%arg0: i32) -> (i32, i32) {
    %c0_i32 = arith.constant 0 : i32
    %c0_i32_0 = arith.constant 0 : i32
    %c0_i32_1 = arith.constant 0 : i32
    return %c0_i32, %c0_i32_0 : i32, i32
  }
  func.func @transform_3(%arg0: i32) -> (i32, i32) {
    %c0_i32 = arith.constant 0 : i32
    %c0_i32_0 = arith.constant 0 : i32
    %c0_i32_1 = arith.constant 0 : i32
    return %c0_i32, %c0_i32_0 : i32, i32
  }
  func.func @transform_4(%arg0: i32) -> (i32, i32) {
    %c0_i32 = arith.constant 0 : i32
    %c0_i32_0 = arith.constant 0 : i32
    %c0_i32_1 = arith.constant 0 : i32
    return %c0_i32, %c0_i32_0 : i32, i32
  }
  func.func @transform_5(%arg0: i32) -> (i32, i32) {
    %c0_i32 = arith.constant 0 : i32
    %c0_i32_0 = arith.constant 0 : i32
    %c0_i32_1 = arith.constant 0 : i32
    return %c0_i32, %c0_i32_0 : i32, i32
  }
  func.func @transform_6(%arg0: i32) -> (i32, i32) {
    %c0_i32 = arith.constant 0 : i32
    %c0_i32_0 = arith.constant 0 : i32
    %c0_i32_1 = arith.constant 0 : i32
    return %c0_i32, %c0_i32_0 : i32, i32
  }
  func.func @transform_7(%arg0: i32) -> (i32, i32) {
    %c0_i32 = arith.constant 0 : i32
    %c0_i32_0 = arith.constant 0 : i32
    %c0_i32_1 = arith.constant 0 : i32
    return %c0_i32, %c0_i32_0 : i32, i32
  }
  func.func @transform_8(%arg0: i32) -> (i32, i32) {
    %c0_i32 = arith.constant 0 : i32
    %c0_i32_0 = arith.constant 0 : i32
    return %arg0, %c0_i32 : i32, i32
  }
}

</mosaic_0001>

<bundles_post_ra>
// kernel: simple_model_forward.1
= control target key start
LH: loop header
LB: loop body
LE: loop exit
PB: predicated region body
PF: predicated region fallthrough
CT: control target
= control target key end

     0   :  { %13 = vsyncpa [#allocation3], 0  ;;  %s1655_s0 = inlined_call_operand.hbm [shape: f32[8,32], index: 0, kind: input, shape index: {}]   ;;  %s1656_s1 = inlined_call_operand.hbm [shape: bf16[32,128], index: 1, kind: input, shape index: {}]   ;;  %s1657_s2 = inlined_call_operand.hbm [shape: bf16[128,256], index: 2, kind: input, shape index: {}]   ;;  %s1658_s3 = inlined_call_operand.hbm [shape: bf16[256,256], index: 3, kind: input, shape index: {}]   ;;  %s1659_s4 = inlined_call_operand.hbm [shape: bf16[256,128], index: 4, kind: input, shape index: {}]   ;;  %s1660_s5 = inlined_call_operand.hbm [shape: bf16[128,128], index: 5, kind: input, shape index: {}]   ;;  %s1661_s6 = inlined_call_operand.hbm [shape: bf16[128,128], index: 6, kind: input, shape index: {}]   ;;  %s1662_s7 = inlined_call_operand.vmem [shape: f32[8,256], index: 7, kind: input, shape index: {}]   ;;  %s1663_s8 = inlined_call_operand.vmem [shape: f32[8,4], index: 8, kind: output, shape index: {}]  }
   0x1   :  { %14 = vsyncpa [#allocation5], 0 }
   0x2   :  { %15 = vsyncpa [#allocation8], 0 }
   0x3   :  { %16 = vsyncpa [#allocation11], 0  ;;  %s1445_s27 = smov [#allocation4]   ;;  %s1283_s9 = scalar_lea.hbm %s1656_s1, 256 }
   0x4   :  { %s32_s28 = sshll.u32 %s1445_s27, 4  ;;  %p1284_p0 = scmp.ne.s32.totalorder %s1656_s1, %s1283_s9  ;;  %s33_s28 = int_to_ptr.vmem [resolvable:$true] %s32_s28 }
   0x5   :  { %p1287_p1 = scmp.lt.u32.totalorder %s1283_s9, %s1656_s1 }
   0x7   :  { %p1289_p2 = pnand %p1287_p1, %p1284_p0 }
   0x9   :  { %1292 = shalt.err (!%p1289_p2)
}
   0xa   :  { %s1293_s14 = scalar_lea.vmem %s33_s28, 256  ;;  %p1298_p4 = scmp.lt.s32.totalorder %s33_s28, %s33_s28 }
   0xb   :  { %p1294_p3 = scmp.ne.s32.totalorder %s33_s28, %s1293_s14  ;;  %p1299_p5 = scmp.lt.s32.totalorder %s1293_s14, %s1293_s14 }
   0xd   :  { %p1300_p6 = por %p1299_p5, %p1298_p4 }
   0xf   :  { %p1301_p7 = pnand %p1300_p6, %p1294_p3 }
  0x11   :  { %1304 = shalt.err (!%p1301_p7)
}
  0x12   :  { %s1446_s15 = smov 64   ;;  %s1447_s16 = smov 4  }
  0x13   :  { %38 = dma.hbm_to_vmem [thread:$0]  %s1656_s1, 256, %s33_s28, [#allocation5], %s1446_s15, %s1446_s15, %s1447_s16  }
  0x14   :  { %s1448_s19 = smov [#allocation7]   ;;  %s1449_s21 = smov [#allocation10]  }
  0x15   :  { %s56_s20 = sshll.u32 %s1448_s19, 4  ;;  %s80_s22 = sshll.u32 %s1449_s21, 4  ;;  %s57_s20 = int_to_ptr.vmem [resolvable:$true] %s56_s20  ;;  %s81_s22 = int_to_ptr.vmem [resolvable:$true] %s80_s22 }
  0x16   :  { %s1305_s25 = scalar_lea.hbm %s1658_s3, 4096 }
  0x17   :  { %p1306_p8 = scmp.ne.s32.totalorder %s1658_s3, %s1305_s25  ;;  %p1309_p9 = scmp.lt.u32.totalorder %s1305_s25, %s1658_s3 }
  0x19   :  { %p1311_p10 = pnand %p1309_p9, %p1306_p8 }
  0x1b   :  { %1314 = shalt.err (!%p1311_p10)
}
  0x1c   :  { %s1315_s1 = scalar_lea.vmem %s57_s20, 4096  ;;  %p1320_p12 = scmp.lt.s32.totalorder %s57_s20, %s57_s20 }
  0x1d   :  { %p1316_p11 = scmp.ne.s32.totalorder %s57_s20, %s1315_s1  ;;  %p1321_p13 = scmp.lt.s32.totalorder %s1315_s1, %s1315_s1 }
  0x1f   :  { %p1322_p0 = por %p1321_p13, %p1320_p12 }
  0x21   :  { %p1323_p1 = pnand %p1322_p0, %p1316_p11 }
  0x23   :  { %1326 = shalt.err (!%p1323_p1)
}
  0x24   :  { %s1450_s28 = smov 128   ;;  %s1451_s9 = smov 8  }
  0x25   :  { %62 = dma.hbm_to_vmem [thread:$0]  %s1658_s3, 4096, %s57_s20, [#allocation8], %s1450_s28, %s1450_s28, %s1451_s9  }
  0x26   :  { %s1327_s14 = scalar_lea.hbm %s1660_s5, 1024 }
  0x27   :  { %p1328_p2 = scmp.ne.s32.totalorder %s1660_s5, %s1327_s14  ;;  %p1331_p3 = scmp.lt.u32.totalorder %s1327_s14, %s1660_s5 }
  0x29   :  { %p1333_p4 = pnand %p1331_p3, %p1328_p2 }
  0x2b   :  { %1336 = shalt.err (!%p1333_p4)
}
  0x2c   :  { %s1337_s23 = scalar_lea.vmem %s81_s22, 1024  ;;  %p1342_p6 = scmp.lt.s32.totalorder %s81_s22, %s81_s22 }
  0x2d   :  { %p1338_p5 = scmp.ne.s32.totalorder %s81_s22, %s1337_s23  ;;  %p1343_p7 = scmp.lt.s32.totalorder %s1337_s23, %s1337_s23 }
  0x2f   :  { %p1344_p8 = por %p1343_p7, %p1342_p6 }
  0x31   :  { %p1345_p9 = pnand %p1344_p8, %p1338_p5 }
  0x33   :  { %1348 = shalt.err (!%p1345_p9)
}
  0x34   :  { %86 = dma.hbm_to_vmem [thread:$0]  %s1660_s5, 1024, %s81_s22, [#allocation11], %s1446_s15, %s1446_s15, %s1447_s16  }
  0x35   :  { %s1452_s24 = smov [#allocation2]   ;;  %s1453_s26 = smov [#allocation6]  }
  0x36   :  { %s23_s25 = sshll.u32 %s1452_s24, 4  ;;  %s44_s27 = sshll.u32 %s1453_s26, 4  ;;  %s24_s25 = int_to_ptr.vmem [resolvable:$true] %s23_s25  ;;  %s45_s27 = int_to_ptr.vmem [resolvable:$true] %s44_s27 }
  0x37   :  { %s1349_s1 = scalar_lea.hbm %s1655_s0, 128 }
  0x38   :  { %p1350_p10 = scmp.ne.s32.totalorder %s1655_s0, %s1349_s1  ;;  %p1353_p11 = scmp.lt.u32.totalorder %s1349_s1, %s1655_s0 }
  0x3a   :  { %p1355_p12 = pnand %p1353_p11, %p1350_p10 }
  0x3c   :  { %1358 = shalt.err (!%p1355_p12)
}
  0x3d   :  { %s1359_s5 = scalar_lea.vmem %s24_s25, 128  ;;  %p1364_p0 = scmp.lt.s32.totalorder %s24_s25, %s24_s25 }
  0x3e   :  { %p1360_p13 = scmp.ne.s32.totalorder %s24_s25, %s1359_s5  ;;  %p1365_p1 = scmp.lt.s32.totalorder %s1359_s5, %s1359_s5 }
  0x40   :  { %p1366_p2 = por %p1365_p1, %p1364_p0 }
  0x42   :  { %p1367_p3 = pnand %p1366_p2, %p1360_p13 }
  0x44   :  { %1370 = shalt.err (!%p1367_p3)
}
  0x45   :  { %26 = dma.hbm_to_vmem [thread:$0]  %s1655_s0, 128, %s24_s25, [#allocation3]  }
  0x46   :  { %s1371_s19 = scalar_lea.hbm %s1657_s2, 2048 }
  0x47   :  { %p1372_p4 = scmp.ne.s32.totalorder %s1657_s2, %s1371_s19  ;;  %p1375_p5 = scmp.lt.u32.totalorder %s1371_s19, %s1657_s2 }
  0x49   :  { %p1377_p6 = pnand %p1375_p5, %p1372_p4 }
  0x4b   :  { %1380 = shalt.err (!%p1377_p6)
}
  0x4c   :  { %s1381_s24 = scalar_lea.vmem %s45_s27, 2048  ;;  %p1386_p8 = scmp.lt.s32.totalorder %s45_s27, %s45_s27 }
  0x4d   :  { %p1382_p7 = scmp.ne.s32.totalorder %s45_s27, %s1381_s24  ;;  %p1387_p9 = scmp.lt.s32.totalorder %s1381_s24, %s1381_s24 }
  0x4f   :  { %p1388_p10 = por %p1387_p9, %p1386_p8 }
  0x51   :  { %p1389_p11 = pnand %p1388_p10, %p1382_p7 }
  0x53   :  { %1392 = shalt.err (!%p1389_p11)
}
  0x54   :  { %50 = dma.hbm_to_vmem [thread:$0]  %s1657_s2, 2048, %s45_s27, [#allocation5], %s1450_s28, %s1450_s28, %s1451_s9  }
  0x55   :  { %s1454_s26 = smov [#allocation9]   ;;  %s1455_s30 = smov [#allocation12]  }
  0x56   :  { %s68_s29 = sshll.u32 %s1454_s26, 4  ;;  %s92_s1 = sshll.u32 %s1455_s30, 4  ;;  %s69_s29 = int_to_ptr.vmem [resolvable:$true] %s68_s29  ;;  %s93_s1 = int_to_ptr.vmem [resolvable:$true] %s92_s1 }
  0x57   :  { %s1393_s12 = scalar_lea.hbm %s1659_s4, 2048 }
  0x58   :  { %p1394_p12 = scmp.ne.s32.totalorder %s1659_s4, %s1393_s12  ;;  %p1397_p13 = scmp.lt.u32.totalorder %s1393_s12, %s1659_s4 }
  0x5a   :  { %p1399_p0 = pnand %p1397_p13, %p1394_p12 }
  0x5c   :  { %1402 = shalt.err (!%p1399_p0)
}
  0x5d   :  { %s1403_s2 = scalar_lea.vmem %s69_s29, 2048  ;;  %p1408_p2 = scmp.lt.s32.totalorder %s69_s29, %s69_s29 }
  0x5e   :  { %p1404_p1 = scmp.ne.s32.totalorder %s69_s29, %s1403_s2  ;;  %p1409_p3 = scmp.lt.s32.totalorder %s1403_s2, %s1403_s2 }
  0x60   :  { %p1410_p4 = por %p1409_p3, %p1408_p2 }
  0x62   :  { %p1411_p5 = pnand %p1410_p4, %p1404_p1 }
  0x64   :  { %1414 = shalt.err (!%p1411_p5)
}
  0x65   :  { %74 = dma.hbm_to_vmem [thread:$0]  %s1659_s4, 2048, %s69_s29, [#allocation8], %s1446_s15, %s1446_s15, %s1447_s16  }
  0x66   :  { %s1415_s18 = scalar_lea.hbm %s1661_s6, 1024 }
  0x67   :  { %p1416_p6 = scmp.ne.s32.totalorder %s1661_s6, %s1415_s18  ;;  %p1419_p7 = scmp.lt.u32.totalorder %s1415_s18, %s1661_s6 }
  0x69   :  { %p1421_p8 = pnand %p1419_p7, %p1416_p6 }
  0x6b   :  { %1424 = shalt.err (!%p1421_p8)
}
  0x6c   :  { %s1425_s20 = scalar_lea.vmem %s93_s1, 1024  ;;  %p1430_p10 = scmp.lt.s32.totalorder %s93_s1, %s93_s1 }
  0x6d   :  { %p1426_p9 = scmp.ne.s32.totalorder %s93_s1, %s1425_s20  ;;  %p1431_p11 = scmp.lt.s32.totalorder %s1425_s20, %s1425_s20 }
  0x6f   :  { %p1432_p12 = por %p1431_p11, %p1430_p10 }
  0x71   :  { %p1433_p13 = pnand %p1432_p12, %p1426_p9 }
  0x73   :  { %1436 = shalt.err (!%p1433_p13)
}
  0x74   :  { %98 = dma.hbm_to_vmem [thread:$0]  %s1661_s6, 1024, %s93_s1, [#allocation11], %s1446_s15, %s1446_s15, %s1447_s16  }
  0x75   :  { %1437 = dma.done.wait [#allocation3], 128  }
  0x76   :  { %1438 = vsyncadd [#allocation3], 4294967168 }
  0x77   :  { %1439 = dma.done.wait [#allocation5], 2304  }
  0x78   :  { %1440 = vsyncadd [#allocation5], 4294964992 }
  0x79   :  { %1441 = dma.done.wait [#allocation8], 6144  }
  0x7a   :  { %1442 = vsyncadd [#allocation8], 4294961152 }
  0x7b   :  { %1443 = dma.done.wait [#allocation11], 2048  }
  0x7c   :  { %1444 = vsyncadd [#allocation11], 4294965248  ;;  %v1456_v0 = vmov 0.0   ;;  %vm1457_vm0 = vmmov 0   ;;  %v1177_v1 = vld [vmem:[#allocation4] sm:$0xff]   ;;  %v1178_v2 = vld [vmem:[#allocation4 + $0x8] sm:$0xff]   ;;  %v131_v50 = vlaneseq }
  0x7d   :  { %1115 = vmatprep.subr.bf16.mxu0 %v1456_v0  ;;  %1119 = vmatprep.mubr.msk.bf16.mxu0 %vm1457_vm0, %v1456_v0  ;;  %v125_v3 = vld [vmem:[#allocation2] sm:$0xff]  ;;  %v1182_v6 = vld [vmem:[#allocation6 + $0x14] ss:$8 sps:$4 sm:$0xff]   ;;  %vm147_vm1 = vcmask 261120   ;;  %v1184_v8 = vld [vmem:[#allocation6 + $0x10] ss:$8 sps:$4 sm:$0xff]  }
  0x7e   :  { %1116 = vmatpush3.bf16.msra.mxu0 %v1177_v1  ;;  %v1179_v4 = vld [vmem:[#allocation6 + $0x4] ss:$8 sps:$4 sm:$0xff]   ;;  %v1181_v5 = vld [vmem:[#allocation6] ss:$8 sps:$4 sm:$0xff]   ;;  %v126_v7 = vpack.c.bf16 %v125_v3, %v125_v3  ;;  %v1188_v11 = vld [vmem:[#allocation6 + $0x34] ss:$8 sps:$4 sm:$0xff]  }
  0x7f   :  { %1117 = vmatprep.subr.bf16.mxu0 %v1456_v0  ;;  %297 = vmatprep.subr.bf16.mxu1 %v1179_v4  ;;  %v1185_v9 = vld [vmem:[#allocation6 + $0x24] ss:$8 sps:$4 sm:$0xff]   ;;  %v1187_v10 = vld [vmem:[#allocation6 + $0x20] ss:$8 sps:$4 sm:$0xff]   ;;  %v1190_v12 = vld [vmem:[#allocation6 + $0x30] ss:$8 sps:$4 sm:$0xff]  }
  0x80   :  { %298 = vmatpush1.bf16.msra.mxu1 %v1181_v5  ;;  %v1191_v13 = vld [vmem:[#allocation6 + $0x44] ss:$8 sps:$4 sm:$0xff]   ;;  %v1193_v14 = vld [vmem:[#allocation6 + $0x40] ss:$8 sps:$4 sm:$0xff]   ;;  %v1194_v15 = vld [vmem:[#allocation6 + $0x54] ss:$8 sps:$4 sm:$0xff]  }
  0x81   :  { %299 = vmatprep.subr.bf16.mxu1 %v1182_v6  ;;  %v1196_v16 = vld [vmem:[#allocation6 + $0x50] ss:$8 sps:$4 sm:$0xff]   ;;  %v1197_v17 = vld [vmem:[#allocation6 + $0x64] ss:$8 sps:$4 sm:$0xff]   ;;  %v1199_v18 = vld [vmem:[#allocation6 + $0x60] ss:$8 sps:$4 sm:$0xff]  }
  0x82   :  { %1118 = vmatpush3.bf16.msra.mxu0 %v1178_v2  ;;  %v1200_v19 = vld [vmem:[#allocation6 + $0x74] ss:$8 sps:$4 sm:$0xff]   ;;  %v1202_v20 = vld [vmem:[#allocation6 + $0x70] ss:$8 sps:$4 sm:$0xff]   ;;  %v1458_v21 = vmov 0   ;;  %v1610_v51 = vshrl.u32 %v131_v50, 7 }
  0x83   :  { %329 = vmatprep.mubr.bf16.mxu1 %v1458_v21  ;;  %v1203_v22 = vld [vmem:[#allocation7] ss:$8 sps:$4 sm:$0xff]   ;;  %v1205_v23 = vld [vmem:[#allocation7 + $0x4] ss:$8 sps:$4 sm:$0xff]   ;;  %v1208_v24 = vld [vmem:[#allocation7 + $0x14] ss:$8 sps:$4 sm:$0xff]  }
  0x84   :  { %300 = vmatpush1.bf16.msra.mxu1 %v1184_v8  ;;  %542 = vmatprep.subr.bf16.mxu0 %v1205_v23  ;;  %v1206_v25 = vld [vmem:[#allocation7 + $0x10] ss:$8 sps:$4 sm:$0xff]   ;;  %v1211_v26 = vld [vmem:[#allocation7 + $0x24] ss:$8 sps:$4 sm:$0xff]   ;;  %v1209_v27 = vld [vmem:[#allocation7 + $0x20] ss:$8 sps:$4 sm:$0xff]  }
  0x85   :  { %1120 = vmatmul.mubr.msk.bf16.vlgmr.msra.gmra.mrb[0].mxu0 %vm147_vm1, %v126_v7  ;;  %301 = vmatprep.subr.bf16.mxu1 %v1185_v9  ;;  %v1214_v28 = vld [vmem:[#allocation7 + $0x34] ss:$8 sps:$4 sm:$0xff]   ;;  %v1212_v29 = vld [vmem:[#allocation7 + $0x30] ss:$8 sps:$4 sm:$0xff]   ;;  %v1217_v30 = vld [vmem:[#allocation7 + $0x44] ss:$8 sps:$4 sm:$0xff]  }
  0x86   :  { %543 = vmatpush1.bf16.msra.mxu0 %v1203_v22  ;;  %v1215_v31 = vld [vmem:[#allocation7 + $0x40] ss:$8 sps:$4 sm:$0xff]   ;;  %v1220_v32 = vld [vmem:[#allocation7 + $0x54] ss:$8 sps:$4 sm:$0xff]   ;;  %v1218_v33 = vld [vmem:[#allocation7 + $0x50] ss:$8 sps:$4 sm:$0xff]  }
  0x87   :  { %544 = vmatprep.subr.bf16.mxu0 %v1208_v24  ;;  %v1223_v34 = vld [vmem:[#allocation7 + $0x64] ss:$8 sps:$4 sm:$0xff]   ;;  %v1221_v35 = vld [vmem:[#allocation7 + $0x60] ss:$8 sps:$4 sm:$0xff]   ;;  %v1226_v36 = vld [vmem:[#allocation7 + $0x74] ss:$8 sps:$4 sm:$0xff]  }
  0x88   :  { %302 = vmatpush1.bf16.msra.mxu1 %v1187_v10  ;;  %v1224_v37 = vld [vmem:[#allocation7 + $0x70] ss:$8 sps:$4 sm:$0xff]   ;;  %v1229_v38 = vld [vmem:[#allocation7 + $0x84] ss:$8 sps:$4 sm:$0xff]   ;;  %v1227_v39 = vld [vmem:[#allocation7 + $0x80] ss:$8 sps:$4 sm:$0xff]  }
  0x89   :  { %303 = vmatprep.subr.bf16.mxu1 %v1188_v11  ;;  %v1232_v40 = vld [vmem:[#allocation7 + $0x94] ss:$8 sps:$4 sm:$0xff]   ;;  %v1230_v41 = vld [vmem:[#allocation7 + $0x90] ss:$8 sps:$4 sm:$0xff]   ;;  %v1235_v42 = vld [vmem:[#allocation7 + $0xa4] ss:$8 sps:$4 sm:$0xff]  }
  0x8a   :  { %545 = vmatpush1.bf16.msra.mxu0 %v1206_v25  ;;  %v1233_v43 = vld [vmem:[#allocation7 + $0xa0] ss:$8 sps:$4 sm:$0xff]   ;;  %v1238_v44 = vld [vmem:[#allocation7 + $0xb4] ss:$8 sps:$4 sm:$0xff]   ;;  %v1236_v45 = vld [vmem:[#allocation7 + $0xb0] ss:$8 sps:$4 sm:$0xff]  }
  0x8b   :  { %546 = vmatprep.subr.bf16.mxu0 %v1211_v26  ;;  %v1241_v46 = vld [vmem:[#allocation7 + $0xc4] ss:$8 sps:$4 sm:$0xff]   ;;  %v1239_v47 = vld [vmem:[#allocation7 + $0xc0] ss:$8 sps:$4 sm:$0xff]   ;;  %v1244_v48 = vld [vmem:[#allocation7 + $0xd4] ss:$8 sps:$4 sm:$0xff]  }
  0x8c   :  { %304 = vmatpush1.bf16.msra.mxu1 %v1190_v12  ;;  %v1242_v49 = vld [vmem:[#allocation7 + $0xd0] ss:$8 sps:$4 sm:$0xff]   ;;  %v133_v52 = vsub.s32 0, %v1610_v51  ;;  %v1247_v62 = vld [vmem:[#allocation7 + $0xe4] ss:$8 sps:$4 sm:$0xff]   ;;  %vm979_vm2 = vcmask 31744  }
  0x8d   :  { %305 = vmatprep.subr.bf16.mxu1 %v1191_v13  ;;  %v1616_v53 = vld [vmem:[%s1662_s7] sm:$0xff]  ;;  %v1245_v63 = vld [vmem:[#allocation7 + $0xe0] ss:$8 sps:$4 sm:$0xff]   ;;  %v1255_v7 = vld [vmem:[#allocation9 + $0x50] sm:$0xff]  }
  0x8e   :  { %547 = vmatpush1.bf16.msra.mxu0 %v1209_v27  ;;  %v134_v54 = vrot.slane %v1616_v53, %v133_v52  ;;  %v1250_v1 = vld [vmem:[#allocation7 + $0xf4] ss:$8 sps:$4 sm:$0xff]   ;;  %v1248_v2 = vld [vmem:[#allocation7 + $0xf0] ss:$8 sps:$4 sm:$0xff]   ;;  %v1251_v3 = vld [vmem:[#allocation9 + $0x40] sm:$0xff]  }
  0x8f   :  { %548 = vmatprep.subr.bf16.mxu0 %v1214_v28  ;;  %v1252_v4 = vld [vmem:[#allocation9] sm:$0xff]   ;;  %v1253_v5 = vld [vmem:[#allocation9 + $0x48] sm:$0xff]   ;;  %v1256_v8 = vld [vmem:[#allocation9 + $0x10] sm:$0xff]  }
  0x90   :  { %306 = vmatpush1.bf16.msra.mxu1 %v1193_v14  ;;  %v1254_v6 = vld [vmem:[#allocation9 + $0x8] sm:$0xff]   ;;  %v1257_v9 = vld [vmem:[#allocation9 + $0x58] sm:$0xff]   ;;  %v1259_v11 = vld [vmem:[#allocation9 + $0x60] sm:$0xff]  }
  0x91   :  { %307 = vmatprep.subr.bf16.mxu1 %v1194_v15  ;;  %v1258_v10 = vld [vmem:[#allocation9 + $0x18] sm:$0xff]   ;;  %v1260_v12 = vld [vmem:[#allocation9 + $0x20] sm:$0xff]   ;;  %v1261_v13 = vld [vmem:[#allocation9 + $0x68] sm:$0xff]   ;;  %v211_v15 = vsub.s32 1, %v1610_v51 }
  0x92   :  { %549 = vmatpush1.bf16.msra.mxu0 %v1212_v29  ;;  %v1262_v14 = vld [vmem:[#allocation9 + $0x28] sm:$0xff]   ;;  %v1263_v29 = vld [vmem:[#allocation9 + $0x70] sm:$0xff]   ;;  %v1271_v50 = vld [vmem:[#allocation10 + $0x20] sm:$0xff]  }
  0x93   :  { %550 = vmatprep.subr.bf16.mxu0 %v1217_v30  ;;  %v1264_v30 = vld [vmem:[#allocation9 + $0x30] sm:$0xff]   ;;  %v1272_v52 = vld [vmem:[#allocation10 + $0x28] sm:$0xff]  }
  0x94   :  { %308 = vmatpush1.bf16.msra.mxu1 %v1196_v16  ;;  %v124_v16 = vld [vmem:[%s1662_s7 + $0x8] sm:$0xff] }
  0x95   :  { %309 = vmatprep.subr.bf16.mxu1 %v1197_v17  ;;  %v212_v17 = vrot.slane %v1616_v53, %v211_v15 }
  0x96   :  { %551 = vmatpush1.bf16.msra.mxu0 %v1215_v31  ;;  %v1265_v31 = vld [vmem:[#allocation9 + $0x78] sm:$0xff]  }
  0x97   :  { %552 = vmatprep.subr.bf16.mxu0 %v1220_v32  ;;  %v1266_v32 = vld [vmem:[#allocation9 + $0x38] sm:$0xff]  }
  0x98   :  { %310 = vmatpush1.bf16.msra.mxu1 %v1199_v18  ;;  %v216_v18 = vrot.slane %v124_v16, %v211_v15 }
  0x99   :  { %311 = vmatprep.subr.bf16.mxu1 %v1200_v19 }
  0x9a   :  { %553 = vmatpush1.bf16.msra.mxu0 %v1218_v33  ;;  %v376_v33 = vsub.s32 2, %v1610_v51 }
  0x9b   :  { %554 = vmatprep.subr.bf16.mxu0 %v1223_v34 }
  0x9c   :  { %312 = vmatpush1.bf16.msra.mxu1 %v1202_v20  ;;  %v377_v34 = vrot.slane %v1616_v53, %v376_v33 }
  0x9d   :  { %1075 = vmatprep.subr.bf16.mxu1 %v1251_v3 }
  0x9e   :  { %555 = vmatpush1.bf16.msra.mxu0 %v1221_v35  ;;  %v381_v35 = vrot.slane %v124_v16, %v376_v33 }
  0x9f   :  { %556 = vmatprep.subr.bf16.mxu0 %v1226_v36 }
  0xa2   :  { %557 = vmatpush1.bf16.msra.mxu0 %v1224_v37 }
  0xa3   :  { %558 = vmatprep.subr.bf16.mxu0 %v1229_v38 }
  0xa6   :  { %559 = vmatpush1.bf16.msra.mxu0 %v1227_v39 }
  0xa7   :  { %560 = vmatprep.subr.bf16.mxu0 %v1232_v40 }
  0xaa   :  { %561 = vmatpush1.bf16.msra.mxu0 %v1230_v41 }
  0xab   :  { %562 = vmatprep.subr.bf16.mxu0 %v1235_v42 }
  0xae   :  { %563 = vmatpush1.bf16.msra.mxu0 %v1233_v43 }
  0xaf   :  { %564 = vmatprep.subr.bf16.mxu0 %v1238_v44 }
  0xb2   :  { %565 = vmatpush1.bf16.msra.mxu0 %v1236_v45  ;;  %v1267_v45 = vld [vmem:[#allocation10] sm:$0xff]  }
  0xb3   :  { %566 = vmatprep.subr.bf16.mxu0 %v1241_v46 }
  0xb6   :  { %567 = vmatpush1.bf16.msra.mxu0 %v1239_v47  ;;  %v1268_v47 = vld [vmem:[#allocation10 + $0x8] sm:$0xff]  }
  0xb7   :  { %568 = vmatprep.subr.bf16.mxu0 %v1244_v48  ;;  %v1269_v48 = vld [vmem:[#allocation10 + $0x10] sm:$0xff]  }
  0xba   :  { %569 = vmatpush1.bf16.msra.mxu0 %v1242_v49  ;;  %v1270_v49 = vld [vmem:[#allocation10 + $0x18] sm:$0xff]  }
  0xbb   :  { %570 = vmatprep.subr.bf16.mxu0 %v1247_v62  ;;  %v621_v62 = vsub.s32 3, %v1610_v51 }
  0xbe   :  { %571 = vmatpush1.bf16.msra.mxu0 %v1245_v63 }
  0xbf   :  { %572 = vmatprep.subr.bf16.mxu0 %v1250_v1  ;;  %v622_v1 = vrot.slane %v1616_v53, %v621_v62 }
  0xc2   :  { %573 = vmatpush1.bf16.msra.mxu0 %v1248_v2 }
  0xc3   :  { %1143 = vmatprep.subr.bf16.mxu0 %v1456_v0 }
 0x158   :  { %v185_v55 = vpop.f32.mrb[0].mxu0 }
 0x159   :  { %v186_v56 = vadd.f32 %v185_v55, %v134_v54  ;;  %v1121_v57 = vpop.f32.mrb[1].mxu0  ;;  %v1273_v54 = vld [vmem:[#allocation10 + $0x30] sm:$0xff]   ;;  %v1274_v55 = vld [vmem:[#allocation10 + $0x38] sm:$0xff]  }
 0x15a   :  { %v188_v58 = vpop.f32.mrb[2].mxu0  ;;  %v1276_v57 = vld [vmem:[#allocation12 + $0x8] sm:$0xff]  }
 0x15b   :  { %v191_v59 = vmax.f32 %v186_v56, 0.0  ;;  %v1122_v60 = vpop.f32.mrb[3].mxu0  ;;  %v1275_v56 = vld [vmem:[#allocation12] sm:$0xff]   ;;  %v1277_v58 = vld [vmem:[#allocation12 + $0x10] sm:$0xff]  }
 0x15c   :  { %v1279_v60 = vld [vmem:[#allocation12 + $0x20] sm:$0xff]  }
 0x15d   :  { %v192_v61 = vpack.c.bf16 %v191_v59, %v191_v59  ;;  %v1278_v59 = vld [vmem:[#allocation12 + $0x18] sm:$0xff]  }
 0x15f   :  { %330 = vmatmul.mubr.bf16.vlgmr.msra.gmra.mrb[0].mxu1 %v192_v61  ;;  %v1280_v61 = vld [vmem:[#allocation12 + $0x28] sm:$0xff]  }
 0x160   :  { %1076 = vmatpush3.bf16.msra.mxu1 %v1252_v4 }
 0x161   :  { %1077 = vmatprep.subr.bf16.mxu1 %v1253_v5 }
 0x164   :  { %1078 = vmatpush3.bf16.msra.mxu1 %v1254_v6 }
 0x165   :  { %1079 = vmatprep.subr.bf16.mxu1 %v1255_v7 }
 0x168   :  { %1080 = vmatpush3.bf16.msra.mxu1 %v1256_v8 }
 0x169   :  { %1081 = vmatprep.subr.bf16.mxu1 %v1257_v9  ;;  %v1281_v9 = vld [vmem:[#allocation12 + $0x30] sm:$0xff]  }
 0x16c   :  { %1082 = vmatpush3.bf16.msra.mxu1 %v1258_v10  ;;  %v1282_v10 = vld [vmem:[#allocation12 + $0x38] sm:$0xff]  }
 0x16d   :  { %1083 = vmatprep.subr.bf16.mxu1 %v1259_v11  ;;  %v779_v11 = vsub.s32 4, %v1610_v51 }
 0x170   :  { %1084 = vmatpush3.bf16.msra.mxu1 %v1260_v12  ;;  %v780_v12 = vrot.slane %v1616_v53, %v779_v11 }
 0x171   :  { %1085 = vmatprep.subr.bf16.mxu1 %v1261_v13 }
 0x174   :  { %1086 = vmatpush3.bf16.msra.mxu1 %v1262_v14 }
 0x175   :  { %1087 = vmatprep.subr.bf16.mxu1 %v1263_v29 }
 0x178   :  { %1088 = vmatpush3.bf16.msra.mxu1 %v1264_v30 }
 0x179   :  { %1089 = vmatprep.subr.bf16.mxu1 %v1265_v31 }
 0x17c   :  { %1090 = vmatpush3.bf16.msra.mxu1 %v1266_v32 }
 0x17d   :  { %1123 = vmatprep.subr.bf16.mxu1 %v1456_v0 }
 0x232   :  { %v331_v19 = vpop.f32.mrb[0].mxu1 }
 0x233   :  { %v332_v20 = vadd.f32 %v331_v19, %v212_v17  ;;  %v333_v21 = vpop.f32.mrb[1].mxu1 }
 0x234   :  { %v334_v22 = vadd.f32 %v333_v21, %v216_v18  ;;  %v335_v23 = vpop.f32.mrb[2].mxu1 }
 0x235   :  { %v338_v24 = vmax.f32 %v332_v20, 0.0  ;;  %v336_v25 = vpop.f32.mrb[3].mxu1  ;;  %v889_v20 = vsub.s32 5, %v1610_v51 }
 0x236   :  { %v339_v26 = vmax.f32 %v334_v22, 0.0 }
 0x237   :  { %v340_v28 = vpack.c.bf16 %v338_v24, %v338_v24  ;;  %v890_v21 = vrot.slane %v1616_v53, %v889_v20 }
 0x238   :  { %v341_v27 = vpack.c.bf16 %v339_v26, %v339_v26 }
 0x23a   :  { %574 = vmatprep.mubr.bf16.mxu0 %v341_v27 }
 0x23b   :  { %575 = vmatmul.mubr.bf16.vlgmr.msra.gmra.mrb[4].mxu0 %v340_v28 }
 0x23c   :  { %1159 = vmatprep.mubr.msk.bf16.mxu0 %vm1457_vm0, %v1456_v0  ;;  %1144 = vmatpush3.bf16.msra.mxu0 %v1275_v56 }
 0x23d   :  { %1145 = vmatprep.subr.bf16.mxu0 %v1456_v0 }
 0x240   :  { %1146 = vmatpush3.bf16.msra.mxu0 %v1276_v57 }
 0x241   :  { %1147 = vmatprep.subr.bf16.mxu0 %v1456_v0 }
 0x244   :  { %1148 = vmatpush3.bf16.msra.mxu0 %v1277_v58 }
 0x245   :  { %1149 = vmatprep.subr.bf16.mxu0 %v1456_v0 }
 0x248   :  { %1150 = vmatpush3.bf16.msra.mxu0 %v1278_v59 }
 0x249   :  { %1151 = vmatprep.subr.bf16.mxu0 %v1456_v0 }
 0x24c   :  { %1152 = vmatpush3.bf16.msra.mxu0 %v1279_v60 }
 0x24d   :  { %1153 = vmatprep.subr.bf16.mxu0 %v1456_v0 }
 0x250   :  { %1154 = vmatpush3.bf16.msra.mxu0 %v1280_v61 }
 0x251   :  { %1155 = vmatprep.subr.bf16.mxu0 %v1456_v0 }
 0x254   :  { %1156 = vmatpush3.bf16.msra.mxu0 %v1281_v9 }
 0x255   :  { %1157 = vmatprep.subr.bf16.mxu0 %v1456_v0 }
 0x258   :  { %1158 = vmatpush3.bf16.msra.mxu0 %v1282_v10 }
 0x30e   :  { %v576_v36 = vpop.f32.mrb[4].mxu0 }
 0x30f   :  { %v577_v37 = vadd.f32 %v576_v36, %v377_v34  ;;  %v578_v38 = vpop.f32.mrb[5].mxu0 }
 0x310   :  { %v579_v39 = vadd.f32 %v578_v38, %v381_v35  ;;  %v580_v40 = vpop.f32.mrb[6].mxu0 }
 0x311   :  { %v583_v41 = vmax.f32 %v577_v37, 0.0  ;;  %v581_v42 = vpop.f32.mrb[7].mxu0 }
 0x312   :  { %v584_v43 = vmax.f32 %v579_v39, 0.0 }
 0x313   :  { %v585_v46 = vpack.c.bf16 %v583_v41, %v583_v41 }
 0x314   :  { %v586_v44 = vpack.c.bf16 %v584_v43, %v584_v43 }
 0x316   :  { %751 = vmatprep.mubr.bf16.mxu1 %v586_v44 }
 0x317   :  { %752 = vmatmul.mubr.bf16.vlgmr.msra.gmra.mrb[4].mxu1 %v585_v46 }
 0x318   :  { %1124 = vmatpush3.bf16.msra.mxu1 %v1267_v45  ;;  %1139 = vmatprep.mubr.msk.bf16.mxu1 %vm1457_vm0, %v1456_v0 }
 0x319   :  { %1125 = vmatprep.subr.bf16.mxu1 %v1456_v0 }
 0x31c   :  { %1126 = vmatpush3.bf16.msra.mxu1 %v1268_v47 }
 0x31d   :  { %1127 = vmatprep.subr.bf16.mxu1 %v1456_v0 }
 0x320   :  { %1128 = vmatpush3.bf16.msra.mxu1 %v1269_v48 }
 0x321   :  { %1129 = vmatprep.subr.bf16.mxu1 %v1456_v0 }
 0x324   :  { %1130 = vmatpush3.bf16.msra.mxu1 %v1270_v49 }
 0x325   :  { %1131 = vmatprep.subr.bf16.mxu1 %v1456_v0 }
 0x328   :  { %1132 = vmatpush3.bf16.msra.mxu1 %v1271_v50 }
 0x329   :  { %1133 = vmatprep.subr.bf16.mxu1 %v1456_v0 }
 0x32c   :  { %1134 = vmatpush3.bf16.msra.mxu1 %v1272_v52 }
 0x32d   :  { %1135 = vmatprep.subr.bf16.mxu1 %v1456_v0 }
 0x330   :  { %1136 = vmatpush3.bf16.msra.mxu1 %v1273_v54 }
 0x331   :  { %1137 = vmatprep.subr.bf16.mxu1 %v1456_v0 }
 0x334   :  { %1138 = vmatpush3.bf16.msra.mxu1 %v1274_v55 }
 0x3ea   :  { %v1091_v63 = vpop.f32.mrb[4].mxu1 }
 0x3eb   :  { %v1092_v2 = vpop.f32.mrb[5].mxu1 }
 0x3ec   :  { %v1093_v3 = vadd.f32 %v1092_v2, %v1091_v63  ;;  %v1094_v4 = vpop.f32.mrb[6].mxu1 }
 0x3ed   :  { %v1095_v5 = vpop.f32.mrb[7].mxu1 }
 0x3ee   :  { %v754_v6 = vadd.f32 %v1093_v3, %v622_v1 }
 0x3f0   :  { %v759_v7 = vmax.f32 %v754_v6, 0.0 }
 0x3f2   :  { %v760_v8 = vpack.c.bf16 %v759_v7, %v759_v7 }
 0x3f4   :  { %1140 = vmatmul.mubr.bf16.vlgmr.msra.gmra.mrb[8].mxu1 %v760_v8 }
 0x4c7   :  { %v863_v13 = vpop.f32.mrb[8].mxu1 }
 0x4c8   :  { %v864_v14 = vadd.f32 %v863_v13, %v780_v12  ;;  %v1141_v15 = vpop.f32.mrb[9].mxu1 }
 0x4c9   :  { %v866_v16 = vpop.f32.mrb[10].mxu1 }
 0x4ca   :  { %v869_v17 = vmax.f32 %v864_v14, 0.0  ;;  %v1142_v18 = vpop.f32.mrb[11].mxu1 }
 0x4cc   :  { %v870_v19 = vpack.c.bf16 %v869_v17, %v869_v17 }
 0x4ce   :  { %1160 = vmatmul.mubr.bf16.vlgmr.msra.gmra.mrb[8].mxu0 %v870_v19 }
 0x5a1   :  { %v973_v22 = vpop.f32.mrb[8].mxu0 }
 0x5a2   :  { %v974_v0 = vadd.f32 %v973_v22, %v890_v21  ;;  %v1161_v23 = vpop.f32.mrb[9].mxu0 }
 0x5a3   :  { %v976_v24 = vpop.f32.mrb[10].mxu0 }
 0x5a4   :  { %980 = vst.msk [vmem:[%s1663_s8] sm:$0xff] %vm979_vm2, %v974_v0  ;;  %v1162_v25 = vpop.f32.mrb[11].mxu0 }
 0x5a5   :  { %985 = vsyncpa [#allocation3], 1 }
 0x5a6   :  { %986 = vsyncpa [#allocation5], 1 }
 0x5a7   :  { %987 = vsyncpa [#allocation8], 1 }
 0x5a8   :  { %988 = vsyncpa [#allocation11], 1 }

</bundles_post_ra>
